<compile_context>
chip_gen: v7x
topology: tpu7x:2x2x1
jax: 0.10.0
libtpu: 0.0.40
codegen_flags: <defaults>
</compile_context>

<pallas_src>
import numpy as np
import jax
import jax.numpy as jnp
from jax.experimental import pallas as pl
from jax.experimental.pallas import tpu as pltpu

BN_EPS = 1e-5


def _fp_kernel(unk_ref, kn_ref, kfeat_ref, ufeat_ref,
               w1a_ref, w1b_ref, b1_ref, w2_ref, b2_ref, out_ref):
    # Layout: channels on sublanes, points on lanes.
    #   unk_ref   (1, 3, tn)   f32  query-point coords for this n-tile
    #   kn_ref    (1, m, 3)    f32  all known-point coords
    #   kfeat_ref (1, C2, m)   cdt  known-point features
    #   ufeat_ref (1, C1, tn)  cdt  query-point features for this n-tile
    #   w*_ref                 cdt  BN-folded MLP weights
    #   b*_ref    (h, 1)       f32  BN-folded biases
    #   out_ref   (1, h2, tn)
    unk = unk_ref[0]                      # (3, tn)
    kn = kn_ref[0]                        # (m, 3)
    m = kn_ref.shape[1]
    tn = unk_ref.shape[2]
    cdt = kfeat_ref.dtype

    # --- three_nn: squared distances (m, tn) via direct differences (VPU).
    d = None
    for c in range(3):
        diff = kn[:, c:c + 1] - unk[c:c + 1, :]          # (m,1)-(1,tn) -> (m,tn)
        d = diff * diff if d is None else d + diff * diff

    # --- top-3 nearest + reciprocal-distance weights, accumulated directly
    #     into one (m, tn) scatter matrix; normalized once at the end.
    row = jax.lax.broadcasted_iota(jnp.int32, (m, tn), 0)
    BIG = jnp.float32(1e30)
    BIG_I = jnp.int32(2 ** 30)
    wm = jnp.zeros((m, tn), jnp.float32)
    rsum = jnp.zeros((1, tn), jnp.float32)
    for _ in range(3):
        dmin = jnp.min(d, axis=0, keepdims=True)                          # (1,tn)
        imin = jnp.min(jnp.where(d <= dmin, row, BIG_I), axis=0,
                       keepdims=True)                                     # (1,tn)
        sel = row == imin                                                 # (m,tn)
        r = 1.0 / (dmin + 1e-8)                                           # (1,tn)
        wm = wm + jnp.where(sel, r, 0.0)
        rsum = rsum + r
        d = jnp.where(sel, BIG, d)
    wm = (wm * (1.0 / rsum)).astype(cdt)                                  # (m,tn)

    # --- three_interpolate: interp (C2, tn) = kfeat (C2, m) @ wm (m, tn)
    interp = jnp.dot(kfeat_ref[0], wm, preferred_element_type=jnp.float32)

    # --- SharedMLP layer 1 (1x1 conv + folded BN + ReLU); the channel concat
    #     is expressed as the sum of two matmuls.
    h = (jnp.dot(w1a_ref[...], interp.astype(cdt),
                 preferred_element_type=jnp.float32)
         + jnp.dot(w1b_ref[...], ufeat_ref[0],
                   preferred_element_type=jnp.float32)
         + b1_ref[...])
    h = jnp.maximum(h, 0.0)

    # --- SharedMLP layer 2
    h = jnp.dot(w2_ref[...], h.astype(cdt),
                preferred_element_type=jnp.float32) + b2_ref[...]
    out_ref[0] = jnp.maximum(h, 0.0).astype(out_ref.dtype)


def _pick_tile_n(n, m):
    # Keep the (m, tile_n) f32 temporaries under ~10 MiB so the working set is
    # safe for every generation's scoped-VMEM (incl. v7x's 64 MiB physical).
    budget = 10 << 20
    for t in (512, 256, 128):
        if n % t == 0 and 8 * m * t * 4 <= budget:
            return t
    return n


def pointnet_fp_forward(unknown, known, unknow_feats, known_feats, params,
                        compute_dtype=jnp.bfloat16, out_dtype=None):
    """unknown (B,n,3), known (B,m,3), unknow_feats (B,C1,n), known_feats (B,C2,m)
    -> (B, mlp[-1], n), same layout as the PyTorch module."""
    B, n, _ = unknown.shape
    m = known.shape[1]
    C2 = known_feats.shape[1]
    C1 = unknow_feats.shape[1]
    (w1, b1, g1, be1), (w2, b2, g2, be2) = params
    h1 = w1.shape[1]
    h2 = w2.shape[1]
    if out_dtype is None:
        out_dtype = known_feats.dtype

    # Glue: only the tiny coordinate tensor is transposed; feature tensors stay
    # in (B, C, N) and the output is written directly as (B, h2, n).
    unknown_t = jnp.transpose(unknown, (0, 2, 1)).astype(jnp.float32)   # (B,3,n)
    known_f = known.astype(jnp.float32)                                 # (B,m,3)
    kfeat = known_feats.astype(compute_dtype)                           # (B,C2,m)
    ufeat = unknow_feats.astype(compute_dtype)                          # (B,C1,n)

    # Fold eval-mode BN (mean=0, var=1) and conv bias into the weights:
    #   y = s*(W x + b) + beta,  s = gamma / sqrt(var + eps)
    s1 = (g1 / jnp.sqrt(1.0 + BN_EPS)).astype(jnp.float32)
    s2 = (g2 / jnp.sqrt(1.0 + BN_EPS)).astype(jnp.float32)
    w1f = s1[:, None] * w1.T                       # (h1, C2+C1)
    w1a = w1f[:, :C2].astype(compute_dtype)        # acts on interpolated feats
    w1b = w1f[:, C2:].astype(compute_dtype)        # acts on unknown-point feats
    b1f = (s1 * b1 + be1).reshape(h1, 1).astype(jnp.float32)
    w2f = (s2[:, None] * w2.T).astype(compute_dtype)   # (h2, h1)
    b2f = (s2 * b2 + be2).reshape(h2, 1).astype(jnp.float32)

    tile_n = _pick_tile_n(n, m)
    n_tiles = n // tile_n

    # Explicit scoped-VMEM budget from the actual per-step footprint.
    cb = jnp.dtype(compute_dtype).itemsize
    ob = jnp.dtype(out_dtype).itemsize
    blk = ((3 * m + 3 * tile_n) * 4 + (C2 * m + C1 * tile_n) * cb
           + h2 * tile_n * ob)
    wts = (h1 * (C2 + C1) + h2 * h1) * cb + (h1 + h2) * 4
    tmp = 8 * m * tile_n * 4
    vmem_limit = int(min(max(2 * blk + wts + tmp + (4 << 20), 32 << 20),
                         56 << 20))

    out = pl.pallas_call(
        _fp_kernel,
        out_shape=jax.ShapeDtypeStruct((B, h2, n), out_dtype),
        grid_spec=pltpu.PrefetchScalarGridSpec(
            num_scalar_prefetch=0,
            grid=(B, n_tiles),
            in_specs=[
                pl.BlockSpec((1, 3, tile_n), lambda b, t: (b, 0, t)),
                pl.BlockSpec((1, m, 3), lambda b, t: (b, 0, 0)),
                pl.BlockSpec((1, C2, m), lambda b, t: (b, 0, 0)),
                pl.BlockSpec((1, C1, tile_n), lambda b, t: (b, 0, t)),
                pl.BlockSpec((h1, C2), lambda b, t: (0, 0)),
                pl.BlockSpec((h1, C1), lambda b, t: (0, 0)),
                pl.BlockSpec((h1, 1), lambda b, t: (0, 0)),
                pl.BlockSpec((h2, h1), lambda b, t: (0, 0)),
                pl.BlockSpec((h2, 1), lambda b, t: (0, 0)),
            ],
            out_specs=pl.BlockSpec((1, h2, tile_n), lambda b, t: (b, 0, t)),
        ),
        compiler_params=pltpu.CompilerParams(
            dimension_semantics=("parallel", "parallel"),
            vmem_limit_bytes=vmem_limit),
    )(unknown_t, known_f, kfeat, ufeat, w1a, w1b, b1f, w2f, b2f)

    return out


def reference(unknown, known, unknow_feats, known_feats, params):
    """Pure-JAX reference of the PyTorch forward (eval-mode BN)."""
    d2 = jnp.sum((unknown[:, :, None, :] - known[:, None, :, :]) ** 2, -1)  # (B,n,m)
    neg3, idx3 = jax.lax.top_k(-d2, 3)
    dist3 = -neg3
    r = 1.0 / (dist3 + 1e-8)
    w = r / jnp.sum(r, -1, keepdims=True)                                   # (B,n,3)
    gathered = jnp.take_along_axis(known_feats[:, :, None, :],
                                   idx3[:, None, :, :], axis=3)             # (B,C2,n,3)
    interp = jnp.sum(gathered * w[:, None, :, :], axis=-1)                  # (B,C2,n)
    x = jnp.concatenate([interp, unknow_feats], axis=1)                     # (B,C,n)

    (w1, b1, g1, be1), (w2, b2, g2, be2) = params
    h = jnp.einsum('bcn,ch->bhn', x, w1) + b1[None, :, None]
    h = g1[None, :, None] * h / jnp.sqrt(1.0 + BN_EPS) + be1[None, :, None]
    h = jnp.maximum(h, 0.0)
    h = jnp.einsum('bcn,ch->bhn', h, w2) + b2[None, :, None]
    h = g2[None, :, None] * h / jnp.sqrt(1.0 + BN_EPS) + be2[None, :, None]
    return jnp.maximum(h, 0.0)


if __name__ == "__main__":
    B, n, m, C1, C2 = 2, 16, 8, 4, 6
    h1, h2 = 32, 16        # SharedMLP([C2 + C1, 32, 16], bn=True)

    key = jax.random.PRNGKey(0)
    ks = jax.random.split(key, 10)
    unknown = jax.random.normal(ks[0], (B, n, 3), jnp.float32)
    known = jax.random.normal(ks[1], (B, m, 3), jnp.float32)
    unknow_feats = jax.random.normal(ks[2], (B, C1, n), jnp.float32)
    known_feats = jax.random.normal(ks[3], (B, C2, m), jnp.float32)

    # deterministic synthetic parameters (bn=True -> conv bias disabled)
    w1 = 0.1 * jax.random.normal(ks[4], (C2 + C1, h1), jnp.float32)
    b1 = jnp.zeros((h1,), jnp.float32)
    g1 = 1.0 + 0.1 * jax.random.normal(ks[5], (h1,), jnp.float32)
    be1 = 0.1 * jax.random.normal(ks[6], (h1,), jnp.float32)
    w2 = 0.1 * jax.random.normal(ks[7], (h1, h2), jnp.float32)
    b2 = jnp.zeros((h2,), jnp.float32)
    g2 = 1.0 + 0.1 * jax.random.normal(ks[8], (h2,), jnp.float32)
    be2 = 0.1 * jax.random.normal(ks[9], (h2,), jnp.float32)
    params = ((w1, b1, g1, be1), (w2, b2, g2, be2))

    ref = reference(unknown, known, unknow_feats, known_feats, params)

    # exact path: f32 MXU operands -> tight tolerance
    out_f32 = pointnet_fp_forward(unknown, known, unknow_feats, known_feats,
                                  params, compute_dtype=jnp.float32)
    out_f32 = jax.block_until_ready(out_f32)
    assert out_f32.shape == (B, h2, n)
    np.testing.assert_allclose(np.asarray(out_f32), np.asarray(ref),
                               rtol=1e-3, atol=1e-3)

    # fast path: bf16 MXU operands (f32 accumulation, f32 NN/weight math)
    out_bf16 = pointnet_fp_forward(unknown, known, unknow_feats, known_feats,
                                   params, compute_dtype=jnp.bfloat16)
    out_bf16 = jax.block_until_ready(out_bf16)
    assert out_bf16.shape == (B, h2, n)
    np.testing.assert_allclose(np.asarray(out_bf16), np.asarray(ref),
                               rtol=3e-2, atol=3e-2)

    print("KERNEL_OK")
</pallas_src>

<mosaic_0001>
module attributes {stable_mosaic.version = 11 : i64} {
  func.func @_fp_kernel(%arg0: i32, %arg1: i32, %arg2: memref<1x3x16xf32, #tpu.memory_space<vmem>>, %arg3: memref<1x8x3xf32, #tpu.memory_space<vmem>>, %arg4: memref<1x6x8xf32, #tpu.memory_space<vmem>>, %arg5: memref<1x4x16xf32, #tpu.memory_space<vmem>>, %arg6: memref<32x6xf32, #tpu.memory_space<vmem>>, %arg7: memref<32x4xf32, #tpu.memory_space<vmem>>, %arg8: memref<32x1xf32, #tpu.memory_space<vmem>>, %arg9: memref<16x32xf32, #tpu.memory_space<vmem>>, %arg10: memref<16x1xf32, #tpu.memory_space<vmem>>, %arg11: memref<1x16x16xf32, #tpu.memory_space<vmem>>) attributes {dimension_semantics = [#tpu.dimension_semantics<parallel>, #tpu.dimension_semantics<parallel>], iteration_bounds = array<i64: 2, 1>, scalar_prefetch = 0 : i64, scratch_operands = 0 : i64, tpu.core_type = #tpu.core_type<tc>, window_params = [{transform_indices = @transform_0, window_bounds = array<i64: 1, 3, 16>}, {transform_indices = @transform_1, window_bounds = array<i64: 1, 8, 3>}, {transform_indices = @transform_2, window_bounds = array<i64: 1, 6, 8>}, {transform_indices = @transform_3, window_bounds = array<i64: 1, 4, 16>}, {pipeline_mode = #tpu.pipeline_mode<synchronous>, transform_indices = @transform_4, window_bounds = array<i64: 32, 6>}, {pipeline_mode = #tpu.pipeline_mode<synchronous>, transform_indices = @transform_5, window_bounds = array<i64: 32, 4>}, {pipeline_mode = #tpu.pipeline_mode<synchronous>, transform_indices = @transform_6, window_bounds = array<i64: 32, 1>}, {pipeline_mode = #tpu.pipeline_mode<synchronous>, transform_indices = @transform_7, window_bounds = array<i64: 16, 32>}, {pipeline_mode = #tpu.pipeline_mode<synchronous>, transform_indices = @transform_8, window_bounds = array<i64: 16, 1>}, {transform_indices = @transform_9, window_bounds = array<i64: 1, 16, 16>}]} {
    %c0 = arith.constant 0 : index
    %c0_0 = arith.constant 0 : index
    %c0_1 = arith.constant 0 : index
    %0 = vector.load %arg2[%c0, %c0_0, %c0_1] : memref<1x3x16xf32, #tpu.memory_space<vmem>>, vector<1x3x16xf32>
    %1 = vector.shape_cast %0 : vector<1x3x16xf32> to vector<3x16xf32>
    %c0_2 = arith.constant 0 : index
    %c0_3 = arith.constant 0 : index
    %c0_4 = arith.constant 0 : index
    %2 = vector.load %arg3[%c0_2, %c0_3, %c0_4] : memref<1x8x3xf32, #tpu.memory_space<vmem>>, vector<1x8x3xf32>
    %3 = vector.shape_cast %2 : vector<1x8x3xf32> to vector<8x3xf32>
    %4 = vector.extract_strided_slice %3 {offsets = [0, 0], sizes = [8, 1], strides = [1, 1]} : vector<8x3xf32> to vector<8x1xf32>
    %5 = vector.extract_strided_slice %1 {offsets = [0, 0], sizes = [1, 16], strides = [1, 1]} : vector<3x16xf32> to vector<1x16xf32>
    %6 = vector.broadcast %4 : vector<8x1xf32> to vector<8x16xf32>
    %7 = vector.broadcast %5 : vector<1x16xf32> to vector<8x16xf32>
    %8 = arith.subf %6, %7 : vector<8x16xf32>
    %9 = arith.mulf %8, %8 : vector<8x16xf32>
    %10 = vector.extract_strided_slice %3 {offsets = [0, 1], sizes = [8, 1], strides = [1, 1]} : vector<8x3xf32> to vector<8x1xf32>
    %11 = vector.extract_strided_slice %1 {offsets = [1, 0], sizes = [1, 16], strides = [1, 1]} : vector<3x16xf32> to vector<1x16xf32>
    %12 = vector.broadcast %10 : vector<8x1xf32> to vector<8x16xf32>
    %13 = vector.broadcast %11 : vector<1x16xf32> to vector<8x16xf32>
    %14 = arith.subf %12, %13 : vector<8x16xf32>
    %15 = arith.mulf %14, %14 : vector<8x16xf32>
    %16 = arith.addf %9, %15 : vector<8x16xf32>
    %17 = vector.extract_strided_slice %3 {offsets = [0, 2], sizes = [8, 1], strides = [1, 1]} : vector<8x3xf32> to vector<8x1xf32>
    %18 = vector.extract_strided_slice %1 {offsets = [2, 0], sizes = [1, 16], strides = [1, 1]} : vector<3x16xf32> to vector<1x16xf32>
    %19 = vector.broadcast %17 : vector<8x1xf32> to vector<8x16xf32>
    %20 = vector.broadcast %18 : vector<1x16xf32> to vector<8x16xf32>
    %21 = arith.subf %19, %20 : vector<8x16xf32>
    %22 = arith.mulf %21, %21 : vector<8x16xf32>
    %23 = arith.addf %16, %22 : vector<8x16xf32>
    %24 = tpu.iota {dimensions = array<i32: 0>} : vector<8x16xi32>
    %cst = arith.constant 0.000000e+00 : f32
    %25 = vector.broadcast %cst : f32 to vector<8x16xf32>
    %cst_5 = arith.constant 0.000000e+00 : f32
    %26 = vector.broadcast %cst_5 : f32 to vector<1x16xf32>
    %cst_6 = arith.constant dense<0x7F800000> : vector<16xf32>
    %27 = vector.multi_reduction <minimumf>, %23, %cst_6 [0] : vector<8x16xf32> to vector<16xf32>
    %28 = vector.shape_cast %27 : vector<16xf32> to vector<1x16xf32>
    %29 = vector.broadcast %28 : vector<1x16xf32> to vector<8x16xf32>
    %30 = arith.cmpf ole, %23, %29 : vector<8x16xf32>
    %c1073741824_i32 = arith.constant 1073741824 : i32
    %31 = vector.broadcast %c1073741824_i32 : i32 to vector<8x16xi32>
    %32 = arith.select %30, %24, %31 : vector<8x16xi1>, vector<8x16xi32>
    %cst_7 = arith.constant dense<2147483647> : vector<16xi32>
    %33 = vector.multi_reduction <minsi>, %32, %cst_7 [0] : vector<8x16xi32> to vector<16xi32>
    %34 = vector.shape_cast %33 : vector<16xi32> to vector<1x16xi32>
    %35 = vector.broadcast %34 : vector<1x16xi32> to vector<8x16xi32>
    %36 = arith.cmpi eq, %24, %35 : vector<8x16xi32>
    %cst_8 = arith.constant 9.99999993E-9 : f32
    %37 = vector.broadcast %cst_8 : f32 to vector<1x16xf32>
    %38 = arith.addf %28, %37 : vector<1x16xf32>
    %cst_9 = arith.constant 1.000000e+00 : f32
    %39 = vector.broadcast %cst_9 : f32 to vector<1x16xf32>
    %40 = arith.divf %39, %38 : vector<1x16xf32>
    %cst_10 = arith.constant 0.000000e+00 : f32
    %41 = vector.shape_cast %40 : vector<1x16xf32> to vector<1x16xf32>
    %42 = vector.broadcast %41 : vector<1x16xf32> to vector<8x16xf32>
    %43 = vector.broadcast %cst_10 : f32 to vector<8x16xf32>
    %44 = arith.select %36, %42, %43 : vector<8x16xi1>, vector<8x16xf32>
    %45 = arith.addf %25, %44 : vector<8x16xf32>
    %46 = arith.addf %26, %40 : vector<1x16xf32>
    %cst_11 = arith.constant 1.000000e+30 : f32
    %47 = vector.broadcast %cst_11 : f32 to vector<8x16xf32>
    %48 = arith.select %36, %47, %23 : vector<8x16xi1>, vector<8x16xf32>
    %cst_12 = arith.constant dense<0x7F800000> : vector<16xf32>
    %49 = vector.multi_reduction <minimumf>, %48, %cst_12 [0] : vector<8x16xf32> to vector<16xf32>
    %50 = vector.shape_cast %49 : vector<16xf32> to vector<1x16xf32>
    %51 = vector.broadcast %50 : vector<1x16xf32> to vector<8x16xf32>
    %52 = arith.cmpf ole, %48, %51 : vector<8x16xf32>
    %c1073741824_i32_13 = arith.constant 1073741824 : i32
    %53 = vector.broadcast %c1073741824_i32_13 : i32 to vector<8x16xi32>
    %54 = arith.select %52, %24, %53 : vector<8x16xi1>, vector<8x16xi32>
    %cst_14 = arith.constant dense<2147483647> : vector<16xi32>
    %55 = vector.multi_reduction <minsi>, %54, %cst_14 [0] : vector<8x16xi32> to vector<16xi32>
    %56 = vector.shape_cast %55 : vector<16xi32> to vector<1x16xi32>
    %57 = vector.broadcast %56 : vector<1x16xi32> to vector<8x16xi32>
    %58 = arith.cmpi eq, %24, %57 : vector<8x16xi32>
    %cst_15 = arith.constant 9.99999993E-9 : f32
    %59 = vector.broadcast %cst_15 : f32 to vector<1x16xf32>
    %60 = arith.addf %50, %59 : vector<1x16xf32>
    %cst_16 = arith.constant 1.000000e+00 : f32
    %61 = vector.broadcast %cst_16 : f32 to vector<1x16xf32>
    %62 = arith.divf %61, %60 : vector<1x16xf32>
    %cst_17 = arith.constant 0.000000e+00 : f32
    %63 = vector.shape_cast %62 : vector<1x16xf32> to vector<1x16xf32>
    %64 = vector.broadcast %63 : vector<1x16xf32> to vector<8x16xf32>
    %65 = vector.broadcast %cst_17 : f32 to vector<8x16xf32>
    %66 = arith.select %58, %64, %65 : vector<8x16xi1>, vector<8x16xf32>
    %67 = arith.addf %45, %66 : vector<8x16xf32>
    %68 = arith.addf %46, %62 : vector<1x16xf32>
    %cst_18 = arith.constant 1.000000e+30 : f32
    %69 = vector.broadcast %cst_18 : f32 to vector<8x16xf32>
    %70 = arith.select %58, %69, %48 : vector<8x16xi1>, vector<8x16xf32>
    %cst_19 = arith.constant dense<0x7F800000> : vector<16xf32>
    %71 = vector.multi_reduction <minimumf>, %70, %cst_19 [0] : vector<8x16xf32> to vector<16xf32>
    %72 = vector.shape_cast %71 : vector<16xf32> to vector<1x16xf32>
    %73 = vector.broadcast %72 : vector<1x16xf32> to vector<8x16xf32>
    %74 = arith.cmpf ole, %70, %73 : vector<8x16xf32>
    %c1073741824_i32_20 = arith.constant 1073741824 : i32
    %75 = vector.broadcast %c1073741824_i32_20 : i32 to vector<8x16xi32>
    %76 = arith.select %74, %24, %75 : vector<8x16xi1>, vector<8x16xi32>
    %cst_21 = arith.constant dense<2147483647> : vector<16xi32>
    %77 = vector.multi_reduction <minsi>, %76, %cst_21 [0] : vector<8x16xi32> to vector<16xi32>
    %78 = vector.shape_cast %77 : vector<16xi32> to vector<1x16xi32>
    %79 = vector.broadcast %78 : vector<1x16xi32> to vector<8x16xi32>
    %80 = arith.cmpi eq, %24, %79 : vector<8x16xi32>
    %cst_22 = arith.constant 9.99999993E-9 : f32
    %81 = vector.broadcast %cst_22 : f32 to vector<1x16xf32>
    %82 = arith.addf %72, %81 : vector<1x16xf32>
    %cst_23 = arith.constant 1.000000e+00 : f32
    %83 = vector.broadcast %cst_23 : f32 to vector<1x16xf32>
    %84 = arith.divf %83, %82 : vector<1x16xf32>
    %cst_24 = arith.constant 0.000000e+00 : f32
    %85 = vector.shape_cast %84 : vector<1x16xf32> to vector<1x16xf32>
    %86 = vector.broadcast %85 : vector<1x16xf32> to vector<8x16xf32>
    %87 = vector.broadcast %cst_24 : f32 to vector<8x16xf32>
    %88 = arith.select %80, %86, %87 : vector<8x16xi1>, vector<8x16xf32>
    %89 = arith.addf %67, %88 : vector<8x16xf32>
    %90 = arith.addf %68, %84 : vector<1x16xf32>
    %cst_25 = arith.constant 1.000000e+00 : f32
    %91 = vector.broadcast %cst_25 : f32 to vector<1x16xf32>
    %92 = arith.divf %91, %90 : vector<1x16xf32>
    %93 = vector.broadcast %92 : vector<1x16xf32> to vector<8x16xf32>
    %94 = arith.mulf %89, %93 : vector<8x16xf32>
    %c0_26 = arith.constant 0 : index
    %c0_27 = arith.constant 0 : index
    %c0_28 = arith.constant 0 : index
    %95 = vector.load %arg4[%c0_26, %c0_27, %c0_28] : memref<1x6x8xf32, #tpu.memory_space<vmem>>, vector<1x6x8xf32>
    %96 = vector.shape_cast %95 : vector<1x6x8xf32> to vector<6x8xf32>
    %cst_29 = arith.constant dense<0.000000e+00> : vector<6x16xf32>
    %97 = tpu.matmul %96, %94, %cst_29 {dimension_numbers = #tpu.dot_dimension_numbers<[1], [0], [0], [1], [0, 0, 1, 1], [], []>} : vector<6x8xf32>, vector<8x16xf32>, vector<6x16xf32> -> vector<6x16xf32>
    %c0_30 = arith.constant 0 : index
    %c0_31 = arith.constant 0 : index
    %98 = vector.load %arg6[%c0_30, %c0_31] : memref<32x6xf32, #tpu.memory_space<vmem>>, vector<32x6xf32>
    %cst_32 = arith.constant dense<0.000000e+00> : vector<32x16xf32>
    %99 = tpu.matmul %98, %97, %cst_32 {dimension_numbers = #tpu.dot_dimension_numbers<[1], [0], [0], [1], [0, 0, 1, 1], [], []>} : vector<32x6xf32>, vector<6x16xf32>, vector<32x16xf32> -> vector<32x16xf32>
    %c0_33 = arith.constant 0 : index
    %c0_34 = arith.constant 0 : index
    %100 = vector.load %arg7[%c0_33, %c0_34] : memref<32x4xf32, #tpu.memory_space<vmem>>, vector<32x4xf32>
    %c0_35 = arith.constant 0 : index
    %c0_36 = arith.constant 0 : index
    %c0_37 = arith.constant 0 : index
    %101 = vector.load %arg5[%c0_35, %c0_36, %c0_37] : memref<1x4x16xf32, #tpu.memory_space<vmem>>, vector<1x4x16xf32>
    %102 = vector.shape_cast %101 : vector<1x4x16xf32> to vector<4x16xf32>
    %cst_38 = arith.constant dense<0.000000e+00> : vector<32x16xf32>
    %103 = tpu.matmul %100, %102, %cst_38 {dimension_numbers = #tpu.dot_dimension_numbers<[1], [0], [0], [1], [0, 0, 1, 1], [], []>} : vector<32x4xf32>, vector<4x16xf32>, vector<32x16xf32> -> vector<32x16xf32>
    %104 = arith.addf %99, %103 : vector<32x16xf32>
    %c0_39 = arith.constant 0 : index
    %c0_40 = arith.constant 0 : index
    %105 = vector.load %arg8[%c0_39, %c0_40] : memref<32x1xf32, #tpu.memory_space<vmem>>, vector<32x1xf32>
    %106 = vector.broadcast %105 : vector<32x1xf32> to vector<32x16xf32>
    %107 = arith.addf %104, %106 : vector<32x16xf32>
    %cst_41 = arith.constant 0.000000e+00 : f32
    %108 = vector.broadcast %cst_41 : f32 to vector<32x16xf32>
    %109 = arith.maximumf %107, %108 : vector<32x16xf32>
    %c0_42 = arith.constant 0 : index
    %c0_43 = arith.constant 0 : index
    %110 = vector.load %arg9[%c0_42, %c0_43] : memref<16x32xf32, #tpu.memory_space<vmem>>, vector<16x32xf32>
    %cst_44 = arith.constant dense<0.000000e+00> : vector<16x16xf32>
    %111 = tpu.matmul %110, %109, %cst_44 {dimension_numbers = #tpu.dot_dimension_numbers<[1], [0], [0], [1], [0, 0, 1, 1], [], []>} : vector<16x32xf32>, vector<32x16xf32>, vector<16x16xf32> -> vector<16x16xf32>
    %c0_45 = arith.constant 0 : index
    %c0_46 = arith.constant 0 : index
    %112 = vector.load %arg10[%c0_45, %c0_46] : memref<16x1xf32, #tpu.memory_space<vmem>>, vector<16x1xf32>
    %113 = vector.broadcast %112 : vector<16x1xf32> to vector<16x16xf32>
    %114 = arith.addf %111, %113 : vector<16x16xf32>
    %cst_47 = arith.constant 0.000000e+00 : f32
    %115 = vector.broadcast %cst_47 : f32 to vector<16x16xf32>
    %116 = arith.maximumf %114, %115 : vector<16x16xf32>
    %c0_48 = arith.constant 0 : index
    %c0_49 = arith.constant 0 : index
    %c0_50 = arith.constant 0 : index
    %117 = vector.load %arg11[%c0_48, %c0_49, %c0_50] : memref<1x16x16xf32, #tpu.memory_space<vmem>>, vector<1x16x16xf32>
    %118 = vector.shape_cast %117 : vector<1x16x16xf32> to vector<16x16xf32>
    %119 = vector.shape_cast %116 : vector<16x16xf32> to vector<1x16x16xf32>
    tpu.vector_store %arg11[%c0_48, %c0_49, %c0_50], %119 {strides = array<i32>} : memref<1x16x16xf32, #tpu.memory_space<vmem>>, vector<1x16x16xf32>,
    return
  }
  func.func @transform_0(%arg0: i32, %arg1: i32) -> (i32, i32, i32) {
    %c0_i32 = arith.constant 0 : i32
    %c0_i32_0 = arith.constant 0 : i32
    return %arg0, %c0_i32, %arg1 : i32, i32, i32
  }
  func.func @transform_1(%arg0: i32, %arg1: i32) -> (i32, i32, i32) {
    %c0_i32 = arith.constant 0 : i32
    %c0_i32_0 = arith.constant 0 : i32
    %c0_i32_1 = arith.constant 0 : i32
    return %arg0, %c0_i32, %c0_i32_0 : i32, i32, i32
  }
  func.func @transform_2(%arg0: i32, %arg1: i32) -> (i32, i32, i32) {
    %c0_i32 = arith.constant 0 : i32
    %c0_i32_0 = arith.constant 0 : i32
    %c0_i32_1 = arith.constant 0 : i32
    return %arg0, %c0_i32, %c0_i32_0 : i32, i32, i32
  }
  func.func @transform_3(%arg0: i32, %arg1: i32) -> (i32, i32, i32) {
    %c0_i32 = arith.constant 0 : i32
    %c0_i32_0 = arith.constant 0 : i32
    return %arg0, %c0_i32, %arg1 : i32, i32, i32
  }
  func.func @transform_4(%arg0: i32, %arg1: i32) -> (i32, i32) {
    %c0_i32 = arith.constant 0 : i32
    %c0_i32_0 = arith.constant 0 : i32
    %c0_i32_1 = arith.constant 0 : i32
    return %c0_i32, %c0_i32_0 : i32, i32
  }
  func.func @transform_5(%arg0: i32, %arg1: i32) -> (i32, i32) {
    %c0_i32 = arith.constant 0 : i32
    %c0_i32_0 = arith.constant 0 : i32
    %c0_i32_1 = arith.constant 0 : i32
    return %c0_i32, %c0_i32_0 : i32, i32
  }
  func.func @transform_6(%arg0: i32, %arg1: i32) -> (i32, i32) {
    %c0_i32 = arith.constant 0 : i32
    %c0_i32_0 = arith.constant 0 : i32
    %c0_i32_1 = arith.constant 0 : i32
    return %c0_i32, %c0_i32_0 : i32, i32
  }
  func.func @transform_7(%arg0: i32, %arg1: i32) -> (i32, i32) {
    %c0_i32 = arith.constant 0 : i32
    %c0_i32_0 = arith.constant 0 : i32
    %c0_i32_1 = arith.constant 0 : i32
    return %c0_i32, %c0_i32_0 : i32, i32
  }
  func.func @transform_8(%arg0: i32, %arg1: i32) -> (i32, i32) {
    %c0_i32 = arith.constant 0 : i32
    %c0_i32_0 = arith.constant 0 : i32
    %c0_i32_1 = arith.constant 0 : i32
    return %c0_i32, %c0_i32_0 : i32, i32
  }
  func.func @transform_9(%arg0: i32, %arg1: i32) -> (i32, i32, i32) {
    %c0_i32 = arith.constant 0 : i32
    %c0_i32_0 = arith.constant 0 : i32
    return %arg0, %c0_i32, %arg1 : i32, i32, i32
  }
}

</mosaic_0001>

<bundles_post_ra>
// kernel: tpu_custom_call.1
= control target key start
LH: loop header
LB: loop body
LE: loop exit
PB: predicated region body
PF: predicated region fallthrough
CT: control target
= control target key end

     0   :  { %14 = vsyncpa [#allocation3], 0  ;;  %s1594_s0 = inlined_call_operand.vmem [shape: f32[2,3,16], index: 0, kind: input, shape index: {}]   ;;  %s1595_s1 = inlined_call_operand.vmem [shape: f32[2,8,3], index: 1, kind: input, shape index: {}]   ;;  %s1596_s2 = inlined_call_operand.vmem [shape: f32[2,6,8], index: 2, kind: input, shape index: {}]   ;;  %s1597_s3 = inlined_call_operand.vmem [shape: f32[2,4,16], index: 3, kind: input, shape index: {}]   ;;  %s1598_s4 = inlined_call_operand.vmem [shape: f32[32,6], index: 4, kind: input, shape index: {}]   ;;  %s1599_s5 = inlined_call_operand.vmem [shape: f32[32,4], index: 5, kind: input, shape index: {}]   ;;  %s1600_s6 = inlined_call_operand.vmem [shape: f32[32,1], index: 6, kind: input, shape index: {}]   ;;  %s1601_s7 = inlined_call_operand.vmem [shape: f32[16,32], index: 7, kind: input, shape index: {}]   ;;  %s1602_s8 = inlined_call_operand.vmem [shape: f32[16,1], index: 8, kind: input, shape index: {}]   ;;  %s1603_s9 = inlined_call_operand.hbm [shape: f32[2,16,16], index: 9, kind: output, shape index: {}]  }
   0x1   :  { %16 = vsyncpa [#allocation3 + $0x1], 0  ;;  %s1389_s30 = smov 0   ;;  %s1391_s10 = smov 0  }
   0x2   :  { %s1393_s11 = smov 0   ;;  %s1395_s12 = smov 0  }
   0x3   :  { %s1397_s13 = smov 0   ;;  %s1399_s14 = smov 0  }
   0x4 LB: > { %s1085_s15 = sadd.s32 4294967295, %s1329_s14   ;;  %s1086_s16 = sadd.s32 4294967294, %s1329_s14   ;;  %s1329_s14 = sphi %s1399_s14, %s22_s14   ;;  %s1325_s13 = sphi %s1397_s13, %s1612_s13   ;;  %s1321_s12 = sphi %s1395_s12, %s1611_s12   ;;  %s1317_s11 = sphi %s1393_s11, %s1610_s11   ;;  %s1313_s10 = sphi %s1391_s10, %s1609_s10   ;;  %s1309_s30 = sphi %s1389_s30, %s1608_s30  }
   0x5   : > { %s34_s17 = sadd.s32 1, %s1325_s13  ;;  %s256_s18 = sadd.s32 1, %s1317_s11 }
   0x6   : > { %p36_p0 = scmp.ge.s32.totalorder %s34_s17, 2  ;;  %p266_p1 = scmp.ne.s32.totalorder %s1317_s11, %s1313_s10 }
   0x7   : > { %p267_p2 = scmp.eq.s32.totalorder %s1085_s15, 1  ;;  %p272_p3 = scmp.ne.s32.totalorder %s1313_s10, %s1309_s30 }
   0x8   : > { %s1614_s17 = smov (%p36_p0, %s34_s17), 0  ;;  %p273_p5 = scmp.eq.s32.totalorder %s1086_s16, 1 }
   0x9   : > { %p1429_p4 = por %p267_p2, %p266_p1  ;;  %s251_s20 = ssub.s32 %s1325_s13, %s1614_s17 }
   0xa   : > { %p1089_p6 = scmp.ge.s32.totalorder %s1329_s14, 1  ;;  %p254_p7 = scmp.eq.s32.totalorder %s251_s20, 0 }
   0xb   : > { %p1436_p8 = por %p273_p5, %p272_p3  ;;  %p340_p9 = scmp.lt.s32.totalorder %s1329_s14, 3 }
   0xc   : > { %s1442_s22 = scalar_select %p254_p7, %s1317_s11, %s256_s18  }
   0xd   : > { %p341_p10 = pnand %p1089_p6, %p340_p9 }
   0xe   : > { %p393_p11 = scmp.lt.s32.totalorder (!%p341_p10), %s1321_s12, 1  ;;  %v1331_v0 = vmov (!%p341_p10), 0   ;;  %v1332_v1 = vmov (!%p341_p10), 2   ;;  %v1333_v3 = vmov (!%p341_p10), 1   ;;  %v1334_v4 = vmov (!%p341_p10), 0.0   ;;  %v615_v6 = vld [vmem:[%s1599_s5] sm:$0xff] (!%p341_p10) }
   0xf   : > { %344 = sbr.rel (%p341_p10) target bundleno = 943 (0x3af), region = 56  ;;  %1238 = vset.pattern.permute.xlu0 (!%p341_p10), %v1331_v0  ;;  %1240 = vset.pattern.permute.xlu1 (!%p341_p10), %v1332_v1  ;;  %vm1335_vm0 = vmmov (!%p341_p10), 0   ;;  %v422_v5 = vlaneseq (!%p341_p10)  ;;  %vm633_vm1 = vcmask (!%p341_p10), 1043456   ;;  %vm620_vm2 = vcmask (!%p341_p10), 31744   ;;  %v616_v8 = vld [vmem:[%s1599_s5 + $0x8] sm:$0xff] (!%p341_p10)  ;;  %v617_v9 = vld [vmem:[%s1599_s5 + $0x10] sm:$0xff] (!%p341_p10) }
  0x10   : > { %1132 = vmatprep.subr.mxu0 (!%p341_p10), %v1334_v4  ;;  %1134 = vmatprep.mubr.msk.f32.mxu0 (!%p341_p10), %vm1335_vm0, %v1334_v4  ;;  %v618_v11 = vld [vmem:[%s1599_s5 + $0x18] sm:$0xff] (!%p341_p10)  ;;  %vm452_vm3 = vcmask (!%p341_p10), 130048   ;;  %s390_s15 = sand.u32 (!%p341_p10), 1, %s1313_s10  }
  0x11   : > { %1139 = vmatprep.mubr.msk.f32.mxu1 (!%p341_p10), %vm620_vm2, %v615_v6  ;;  %v1467_v10 = vshrl.u32 (!%p341_p10), %v422_v5, 7 }
  0x13   : > { %v424_v12 = vsub.s32 (!%p341_p10), 0, %v1467_v10  ;;  %v445_v13 = vsub.s32 (!%p341_p10), 2, %v1467_v10  ;;  %v434_v15 = vsub.s32 (!%p341_p10), 1, %v1467_v10 }
  0x16   : > { %s1446_s23 = scalar_select %p393_p11, %s1321_s12, 1 }
  0x18   : > { %s1604_s24 = sshll.u32 %s1446_s23, 3  ;;  %s1091_s28 = sshll.u32 %s1446_s23, 2 }
  0x19   : > { %s403_s27 = scalar_lea.vmem %s1595_s1, %s1604_s24  ;;  %s414_s16 = scalar_lea.vmem %s1597_s3, %s1091_s28 }
  0x1a   : > { %v416_v2 = vld [vmem:[%s403_s27] sm:$0xff]  ;;  %s399_s20 = scalar_lea.vmem %s1594_s0, %s1091_s28  ;;  %s1607_s24 = sshll.u32 %s1446_s23, 3 }
  0x1b   : > { %419 = vperm.xlu0 %1238, %v416_v2   ;;  %440 = vperm.xlu1 %1240, %v416_v2   ;;  %v619_v7 = vld [vmem:[%s414_s16] sm:$0xf]  ;;  %s407_s26 = scalar_lea.vmem %s1596_s2, %s1607_s24  ;;  %s1090_s16 = sshll.u32 %s390_s15, 4 }
  0x1c   : > { %1137 = vmatprep.subr.msk.mxu1 %vm633_vm1, %v619_v7  ;;  %v415_v14 = vld [vmem:[%s399_s20] sm:$0x7]  ;;  %s392_s23 = scalar_lea.vmem [#allocation2], %s1090_s16  ;;  %s1113_s20 = sshll.u32 %s1321_s12, 8 }
  0x1d   : > { %1138 = vmatpush3.msk.msra.mxu1 %vm633_vm1, %v619_v7  ;;  %v425_v17 = vrot.slane %v415_v14, %v424_v12  ;;  %v446_v18 = vrot.slane %v415_v14, %v445_v13  ;;  %v435_v20 = vrot.slane %v415_v14, %v434_v15  ;;  %s971_s18 = sshll.u32 %s392_s23, 4  ;;  %s1544_s25 = scalar_lea.hbm %s1603_s9, %s1113_s20  ;;  %s1539_s18 = int_to_ptr.vmem [resolvable:$true] %s971_s18 }
  0x1e   : > { %1140 = vmatmul.mubr.msk.f32.vlgmr.msra.gmra.mrb[0].mxu1 %vm620_vm2, %v616_v8  ;;  %s1548_s12 = scalar_lea.sflag [#allocation3], %s390_s15  ;;  %s1336_s27 = smov [#allocation2]  }
  0x1f   : > { %1239 = vset.pattern.permute.xlu0 %v1333_v3  ;;  %1241 = vset.pattern.permute.xlu1 %v1331_v0  ;;  %s1255_s29 = sshll.u32 %s1336_s27, 4  ;;  %s1256_s29 = int_to_ptr.vmem [resolvable:$false] %s1255_s29 }
  0x20   : > { %429 = vperm.xlu0 %1239, %v416_v2   ;;  %1142 = vmatprep.mubr.msk.f32.mxu1 %vm620_vm2, %v617_v9  ;;  %s1257_s16 = scalar_lea.vmem %s1256_s29, 512  ;;  %p1258_p1 = scmp.lt.s32.totalorder %s1539_s18, %s1256_s29 }
  0x22   : > { %1143 = vmatmul.mubr.msk.f32.gmra.mrb[2].mxu1 %vm620_vm2, %v618_v11 }
  0x24   : > { %1242 = vset.pattern.permute.xlu0 %v1331_v0 }
  0x9a   : > { %v420_v16 = vpop.permute.xlu0 %419  ;;  %v441_v19 = vpop.permute.xlu1 %440 }
  0x9b   : > { %v426_v21 = vsub.f32 %v420_v16, %v425_v17  ;;  %v447_v22 = vsub.f32 %v441_v19, %v446_v18 }
  0x9d   : > { %v427_v25 = vmul.f32 %v426_v21, %v426_v21  ;;  %v448_v27 = vmul.f32 %v447_v22, %v447_v22 }
  0x9f   : > { %v430_v23 = vpop.permute.xlu0 %429 }
  0xa0   : > { %v436_v24 = vsub.f32 %v430_v23, %v435_v20 }
  0xa2   : > { %v437_v26 = vmul.f32 %v436_v24, %v436_v24 }
  0xa4   : > { %v438_v28 = vadd.f32 %v437_v26, %v427_v25 }
  0xa6   : > { %v449_v29 = vadd.f32 %v448_v27, %v438_v28 }
  0xa8   : > { %v453_v30 = vsel %vm452_vm3, %v449_v29, inf }
  0xa9   : > { %v454_v31 = vrot.slane %v453_v30, 4 }
  0xab   : > { %v455_v32 = vmin.f32 %v453_v30, %v454_v31  ;;  %v611_v30 = vld [vmem:[%s1598_s4] sm:$0xff]  ;;  %v826_v31 = vld [vmem:[%s1600_s6 + $0x10] sm:$0xff] }
  0xac   : > { %840 = vperm.xlu0 %1242, %v826_v31  }
  0xad   : > { %v456_v33 = vrot.slane %v455_v32, 2 }
  0xaf   : > { %v457_v34 = vmin.f32 %v455_v32, %v456_v33  ;;  %v825_v32 = vld [vmem:[%s1600_s6 + $0x8] sm:$0xff] }
  0xb0   : > { %v859_v33 = vld [vmem:[%s1602_s8 + $0x8] sm:$0xff] }
  0xb1   : > { %v458_v35 = vrot.slane %v457_v34, 1  ;;  %867 = vperm.xlu0 %1242, %v859_v33  }
  0xb3   : > { %v459_v36 = vmin.f32 %v457_v34, %v458_v35  ;;  %v827_v34 = vld [vmem:[%s1600_s6 + $0x18] sm:$0xff]  ;;  %v858_v35 = vld [vmem:[%s1602_s8] sm:$0xff] }
  0xb5   : > { %vm460_vm4 = vcmp.le.f32.partialorder %v449_v29, %v459_v36  ;;  %v473_v38 = vadd.f32 1e-08, %v459_v36 }
  0xb6   : > { %v461_v37 = vsel %vm460_vm4, %v1467_v10, 1073741824  ;;  %vm537_vm4 = vcmask 64512  }
  0xb7   : > { %v462_v39 = vsel %vm452_vm3, %v461_v37, 2147483647  ;;  %1243 = vrcp.f32 %v473_v38  ;;  %v612_v37 = vld [vmem:[%s1598_s4 + $0x8] sm:$0xff] }
  0xb8   : > { %v463_v40 = vrot.slane %v462_v39, 4 }
  0xba   : > { %vm464_vm5 = vcmp.lt.s32.totalorder %v462_v39, %v463_v40 }
  0xbb   : > { %v465_v41 = vsel %vm464_vm5, %v462_v39, %v463_v40  ;;  %vm722_vm5 = vcmask 48128   ;;  %v613_v39 = vld [vmem:[%s1598_s4 + $0x10] sm:$0xff]  ;;  %v614_v40 = vld [vmem:[%s1598_s4 + $0x18] sm:$0xff] }
  0xbc   : > { %v466_v42 = vrot.slane %v465_v41, 2  ;;  %1147 = vmatprep.mubr.msk.f32.mxu1 %vm722_vm5, %v611_v30 }
  0xbe   : > { %vm467_vm6 = vcmp.lt.s32.totalorder %v465_v41, %v466_v42 }
  0xbf   : > { %v468_v43 = vsel %vm467_vm6, %v465_v41, %v466_v42  ;;  %vm735_vm6 = vcmask 1045504   ;;  %v856_v41 = vld [vmem:[%s1601_s7] sm:$0xff] }
  0xc0   : > { %v469_v44 = vrot.slane %v468_v43, 1 }
  0xc1   : > { %v1244_v46 = vpop.eup %1243 }
  0xc2   : > { %vm470_vm7 = vcmp.lt.s32.totalorder %v468_v43, %v469_v44 }
  0xc3   : > { %v471_v45 = vsel %vm470_vm7, %v468_v43, %v469_v44  ;;  %vm870_vm7 = vcmask 261120  }
  0xc4   : > { %vm472_vm8 = vcmp.eq.s32.totalorder %v1467_v10, %v471_v45 }
  0xc5   : > { %v479_v47 = vsel %vm472_vm8, 1e+30, %v449_v29  ;;  %v476_v48 = vsel %vm472_vm8, %v1244_v46, 0.0  ;;  %v536_v29 = vld [vmem:[%s407_s26] sm:$0x3f]  ;;  %s1251_s26 = scalar_lea.vmem %s1539_s18, 256 }
  0xc6   : > { %v480_v49 = vsel %vm452_vm3, %v479_v47, inf  ;;  %p1252_p12 = scmp.ne.s32.totalorder %s1539_s18, %s1251_s26  ;;  %p1259_p2 = scmp.lt.s32.totalorder %s1257_s16, %s1251_s26 }
  0xc7   : > { %v481_v50 = vrot.slane %v480_v49, 4 }
  0xc8   : > { %p1253_p13 = pnand %p1252_p12, %p1429_p4  ;;  %p1260_p3 = por %p1259_p2, %p1258_p1 }
  0xc9   : > { %v482_v51 = vmin.f32 %v480_v49, %v481_v50 }
  0xca   : > { %p1254_p0 = pneg %p1253_p13 }
  0xcb   : > { %v483_v52 = vrot.slane %v482_v51, 2 }
  0xcc   : > { %p1261_p5 = pnand %p1260_p3, %p1254_p0 }
  0xcd   : > { %v484_v53 = vmin.f32 %v482_v51, %v483_v52 }
  0xcf   : > { %v485_v54 = vrot.slane %v484_v53, 1 }
  0xd1   : > { %v486_v55 = vmin.f32 %v484_v53, %v485_v54 }
  0xd3   : > { %vm487_vm9 = vcmp.le.f32.partialorder %v479_v47, %v486_v55  ;;  %v500_v57 = vadd.f32 1e-08, %v486_v55 }
  0xd4   : > { %v488_v56 = vsel %vm487_vm9, %v1467_v10, 1073741824 }
  0xd5   : > { %v489_v58 = vsel %vm452_vm3, %v488_v56, 2147483647  ;;  %1245 = vrcp.f32 %v500_v57 }
  0xd6   : > { %v490_v59 = vrot.slane %v489_v58, 4 }
  0xd8   : > { %vm491_vm10 = vcmp.lt.s32.totalorder %v489_v58, %v490_v59 }
  0xd9   : > { %v492_v60 = vsel %vm491_vm10, %v489_v58, %v490_v59 }
  0xda   : > { %v493_v61 = vrot.slane %v492_v60, 2 }
  0xdc   : > { %vm494_vm11 = vcmp.lt.s32.totalorder %v492_v60, %v493_v61 }
  0xdd   : > { %v495_v62 = vsel %vm494_vm11, %v492_v60, %v493_v61  ;;  %v857_v60 = vld [vmem:[%s1601_s7 + $0x8] sm:$0xff] }
  0xde   : > { %v496_v63 = vrot.slane %v495_v62, 1 }
  0xdf   : > { %v1246_v1 = vpop.eup %1245 }
  0xe0   : > { %vm497_vm12 = vcmp.lt.s32.totalorder %v495_v62, %v496_v63  ;;  %v505_v20 = vadd.f32 %v1246_v1, %v1244_v46 }
  0xe1   : > { %v498_v0 = vsel %vm497_vm12, %v495_v62, %v496_v63 }
  0xe2   : > { %vm499_vm13 = vcmp.eq.s32.totalorder %v1467_v10, %v498_v0 }
  0xe3   : > { %v503_v2 = vsel %vm499_vm13, %v1246_v1, 0.0  ;;  %v506_v3 = vsel %vm499_vm13, 1e+30, %v479_v47 }
  0xe4   : > { %v504_v4 = vadd.f32 %v503_v2, %v476_v48  ;;  %v507_v5 = vsel %vm452_vm3, %v506_v3, inf }
  0xe5   : > { %v508_v6 = vrot.slane %v507_v5, 4 }
  0xe7   : > { %v509_v7 = vmin.f32 %v507_v5, %v508_v6 }
  0xe9   : > { %v510_v8 = vrot.slane %v509_v7, 2 }
  0xeb   : > { %v511_v9 = vmin.f32 %v509_v7, %v510_v8 }
  0xed   : > { %v512_v11 = vrot.slane %v511_v9, 1 }
  0xef   : > { %v513_v12 = vmin.f32 %v511_v9, %v512_v11 }
  0xf1   : > { %vm514_vm14 = vcmp.le.f32.partialorder %v506_v3, %v513_v12  ;;  %v527_v13 = vadd.f32 1e-08, %v513_v12 }
  0xf2   : > { %v515_v14 = vsel %vm514_vm14, %v1467_v10, 1073741824 }
  0xf3   : > { %v516_v15 = vsel %vm452_vm3, %v515_v14, 2147483647  ;;  %1247 = vrcp.f32 %v527_v13 }
  0xf4   : > { %v517_v16 = vrot.slane %v516_v15, 4 }
  0xf6   : > { %vm518_vm15 = vcmp.lt.s32.totalorder %v516_v15, %v517_v16 }
  0xf7   : > { %v519_v17 = vsel %vm518_vm15, %v516_v15, %v517_v16 }
  0xf8   : > { %v520_v18 = vrot.slane %v519_v17, 2 }
  0xfa   : > { %vm521_vm0 = vcmp.lt.s32.totalorder %v519_v17, %v520_v18 }
  0xfb   : > { %v522_v19 = vsel %vm521_vm0, %v519_v17, %v520_v18 }
  0xfc   : > { %v523_v21 = vrot.slane %v522_v19, 1 }
  0xfd   : > { %v1248_v22 = vpop.eup %1247 }
  0xfe   : > { %vm524_vm1 = vcmp.lt.s32.totalorder %v522_v19, %v523_v21  ;;  %v532_v23 = vadd.f32 %v1248_v22, %v505_v20 }
  0xff   : > { %v525_v24 = vsel %vm524_vm1, %v522_v19, %v523_v21 }
 0x100   : > { %vm526_vm2 = vcmp.eq.s32.totalorder %v1467_v10, %v525_v24  ;;  %1249 = vrcp.f32 %v532_v23  ;;  %v824_v10 = vld [vmem:[%s1600_s6] sm:$0xff] }
 0x101   : > { %v530_v25 = vsel %vm526_vm2, %v1248_v22, 0.0  ;;  %830 = vperm.xlu1 %1241, %v824_v10  }
 0x102   : > { %v531_v26 = vadd.f32 %v530_v25, %v504_v4 }
 0x105   : > { %835 = vperm.xlu1 %1241, %v825_v32  }
 0x109   : > { %845 = vperm.xlu1 %1241, %v827_v34  }
 0x10a   : > { %v1250_v27 = vpop.eup %1249 }
 0x10b   : > { %v535_v28 = vmul.f32 %v1250_v27, %v531_v26 }
 0x10d   : > { %1133 = vmatpush3.msra.mxu0 %v535_v28  ;;  %862 = vperm.xlu1 %1241, %v858_v35  }
 0x10e   : > { %1135 = vmatmul.mubr.msk.f32.vlgmr.msra.gmra.mrb[0].mxu0 %vm537_vm4, %v536_v29 }
 0x10f   : > { %1161 = vmatprep.mubr.msk.f32.mxu0 %vm870_vm7, %v856_v41 }
 0x12b   : > { %v841_v53 = vpop.permute.xlu0 %840 }
 0x130   : > { %v868_v61 = vpop.permute.xlu0 %867 }
 0x180   : > { %v831_v42 = vpop.permute.xlu1 %830 }
 0x184   : > { %v836_v43 = vpop.permute.xlu1 %835 }
 0x188   : > { %v846_v49 = vpop.permute.xlu1 %845 }
 0x18c   : > { %v863_v63 = vpop.permute.xlu1 %862 }
 0x1e1   : > { %v607_v36 = vpop.f32.mrb[0].mxu0 }
 0x1e2   : > { %v1136_v38 = vpop.f32.mrb[1].mxu0  ;;  %1145 = vmatprep.subr.msk.mxu1 %vm735_vm6, %v607_v36 }
 0x1e3   : > { %1146 = vmatpush3.msk.msra.mxu1 %vm735_vm6, %v607_v36 }
 0x1e4   : > { %1148 = vmatmul.mubr.msk.f32.vlgmr.msra.gmra.mrb[0].mxu1 %vm722_vm5, %v612_v37 }
 0x1e5   : > { %1150 = vmatprep.mubr.msk.f32.mxu1 %vm722_vm5, %v613_v39 }
 0x1e8   : > { %1151 = vmatmul.mubr.msk.f32.gmra.mrb[2].mxu1 %vm722_vm5, %v614_v40 }
 0x2b7   : > { %v1149_v44 = vpop.f32.mrb[0].mxu1 }
 0x2b8   : > { %v849_v45 = vadd.f32 %v1149_v44, %v836_v43  ;;  %v805_v46 = vpop.f32.mrb[1].mxu1 }
 0x2b9   : > { %v848_v47 = vadd.f32 %v831_v42, %v805_v46 }
 0x2ba   : > { %v853_v48 = vmax.f32 %v849_v45, 0.0 }
 0x2bb   : > { %v852_v50 = vmax.f32 %v848_v47, 0.0  ;;  %v1152_v51 = vpop.f32.mrb[2].mxu1 }
 0x2bc   : > { %v851_v52 = vadd.f32 %v1152_v51, %v846_v49  ;;  %v815_v54 = vpop.f32.mrb[3].mxu1 }
 0x2bd   : > { %v1164_v55 = vpack.c.bf16 %v853_v48, %v852_v50  ;;  %v850_v56 = vadd.f32 %v841_v53, %v815_v54 }
 0x2be   : > { %v855_v57 = vmax.f32 %v851_v52, 0.0 }
 0x2bf   : > { %v854_v58 = vmax.f32 %v850_v56, 0.0  ;;  %1165 = vmatprep.subr.bf16.mxu0 %v1164_v55 }
 0x2c0   : > { %1167 = vmatpush3.bf16.msra.mxu0 %v1164_v55 }
 0x2c1   : > { %v1168_v59 = vpack.c.bf16 %v855_v57, %v854_v58 }
 0x2c3   : > { %1169 = vmatprep.subr.bf16.mxu0 %v1168_v59 }
 0x2c4   : > { %1171 = vmatpush3.bf16.msra.mxu0 %v1168_v59 }
 0x2c7   : > { %1162 = vmatmul.mubr.msk.f32.vlgmr.msra.gmra.mrb[2].mxu0 %vm870_vm7, %v857_v60 }
 0x39a   : > { %v1163_v62 = vpop.f32.mrb[2].mxu0 }
 0x39b   : > { %v949_v0 = vadd.f32 %v1163_v62, %v868_v61  ;;  %v943_v1 = vpop.f32.mrb[3].mxu0 }
 0x39c   : > { %v944_v2 = vadd.f32 %v943_v1, %v863_v63 }
 0x39d   : > { %v953_v3 = vmax.f32 %v949_v0, 0.0 }
 0x39e   : > { %v952_v4 = vmax.f32 %v944_v2, 0.0 }
 0x39f   : > { %955 = vst.msk [vmem:[%s392_s23 + $0x8] sm:$0xff] %vm452_vm3, %v953_v3 }
 0x3a0   : > { %954 = vst.msk [vmem:[%s392_s23] sm:$0xff] %vm452_vm3, %v952_v4 }
 0x3a1   : > { %1264 = shalt.err (!%p1261_p5)
}
 0x3a2   : > { %s1265_s15 = scalar_lea.hbm %s1544_s25, 256  ;;  %s1269_s24 = scalar_lea.hbm %s1603_s9, 512 }
 0x3a3   : > { %p1266_p6 = scmp.ne.s32.totalorder %s1544_s25, %s1265_s15  ;;  %p1270_p10 = scmp.lt.u32.totalorder %s1544_s25, %s1603_s9 }
 0x3a4   : > { %p1271_p11 = scmp.lt.u32.totalorder %s1269_s24, %s1265_s15  ;;  %p1273_p13 = scmp.lt.u32.totalorder %s1265_s15, %s1544_s25 }
 0x3a5   : > { %p1267_p7 = pnand %p1266_p6, %p1429_p4 }
 0x3a6   : > { %p1272_p12 = por %p1271_p11, %p1270_p10 }
 0x3a7   : > { %p1268_p9 = pneg %p1267_p7 }
 0x3a8   : > { %p1274_p0 = por %p1273_p13, %p1272_p12 }
 0x3aa   : > { %p1275_p1 = pnand %p1274_p0, %p1268_p9 }
 0x3ac   : > { %1278 = shalt.err (!%p1275_p1)
}
 0x3ad   : > { %s1337_s26 = smov 128   ;;  %s1338_s29 = smov 8  }
 0x3ae   : > { %1176 = dma.vmem_to_hbm [thread:$0]  (%p1429_p4), %s1539_s18, 256, %s1544_s25, %s1548_s12, %s1337_s26, %s1337_s26, %s1338_s29  }
 0x3af PF: > { %p1182_p2 = scmp.ge.s32.totalorder %s1329_s14, 2  ;;  %s986_s16 = sand.u32 1, %s1309_s30  }
 0x3b0   : > { %s987_s15 = scalar_lea.sflag [#allocation3], %s986_s16 }
 0x3b1   : > { %p1179_p3 = pnand %p1182_p2, %p1436_p8 }
 0x3b3   : > { %1304 = dma.done.wait (!%p1179_p3), %s987_s15, 256  }
 0x3b4   : > { %1306 = vsyncadd (!%p1179_p3), %s987_s15, 4294967040  ;;  %s22_s14 = sadd.s32 1, %s1329_s14   ;;  %s1608_s30 = smov %s1313_s10 }
 0x3b5   : > { %p19_p5 = scmp.ge.s32.totalorder %s22_s14, 4   ;;  %s1609_s10 = smov %s1317_s11 }
 0x3b6   : > { %s1610_s11 = smov %s1442_s22  ;;  %s1611_s12 = smov %s1325_s13 }
 0x3b7   : > { %s1612_s13 = smov %s1614_s17  ;;  %21 = sbr.rel (!%p19_p5) target bundleno = 4 (0x4), region = 100 }
 0x3be   :  { %992 = vsyncpa [#allocation3], 1 }
 0x3bf   :  { %994 = vsyncpa [#allocation3 + $0x1], 1 }

</bundles_post_ra>
